<compile_context>
chip_gen: v7x
topology: tpu7x:2x2x1
jax: 0.10.0
libtpu: 0.0.40
codegen_flags: <defaults>
</compile_context>

<pallas_src>
import jax
import jax.numpy as jnp
from jax.experimental import pallas as pl
from jax.experimental.pallas import tpu as pltpu


def _round_up(v, m):
    return (v + m - 1) // m * m


def attention_kernel(x_ref, w_ref, b_ref, o_ref):
    # x_ref: (Bblk, S, F) native dtype   w_ref: (F, 1) x.dtype
    # b_ref: (1, S, 1) float32           o_ref: (Bblk, F)
    x = x_ref[...]                                   # keep native dtype (no tile upcast)
    bblk, s, f = x.shape

    # ---- scores on the MXU: eij[b, s] = sum_f x[b, s, f] * w[f] ----
    x2d = x.reshape(bblk * s, f)                     # layout no-op when S % 8 == 0
    eij = jnp.dot(x2d, w_ref[...], preferred_element_type=jnp.float32)   # (Bblk*S, 1)
    eij = eij.reshape(bblk, s, 1) + b_ref[...]       # (Bblk, S, 1)

    # tanh bounds scores to (-1, 1), so exp without max-subtraction is safe.
    a = jnp.exp(jnp.tanh(eij))                       # (Bblk, S, 1) f32, tiny
    denom = jnp.sum(a, axis=1, keepdims=True)        # (Bblk, 1, 1)
    # Epsilon added AFTER the division, exactly as in the PyTorch module.
    a = a * pl.reciprocal(denom, approx=True) + 1e-10

    # ---- weighted sum over S (VPU mul + sublane reduce, f32 accumulation) ----
    out = jnp.sum(x * a.astype(x.dtype), axis=1, dtype=jnp.float32)      # (Bblk, F)
    o_ref[...] = out.astype(o_ref.dtype)


def attention_forward(x, weight, bias, *, block_target_bytes=8 * 1024 * 1024):
    """x: (B, S, F); weight: (F, 1); bias: (S,)  ->  (B, F)."""
    B, S, F = x.shape
    out_dtype = x.dtype

    # Batch tiling: largest 8-row-aligned block under the VMEM target, but keep
    # >= 2 grid blocks when B allows it (v7x megacore / DMA overlap), and size
    # the block from cdiv(B, nb) so batch padding is at most a few rows.
    row_bytes = S * F * jnp.dtype(x.dtype).itemsize
    bblk_max = max(8, (block_target_bytes // max(row_bytes, 1)) // 8 * 8)
    if B < 16:
        bblk, nb = B, 1                              # too small to split into >=2 blocks
    else:
        nb = max(pl.cdiv(B, bblk_max), 2)
        bblk = _round_up(pl.cdiv(B, nb), 8)
        nb = pl.cdiv(B, bblk)
    Bp = nb * bblk

    # No feature padding of x in HBM; only (cheap, exact) zero-padding of the batch.
    if Bp != B:
        x = jnp.pad(x, ((0, Bp - B), (0, 0), (0, 0)))

    w2d = weight.reshape(F, 1).astype(x.dtype)       # tiny; loop-invariant
    b3d = bias.reshape(1, S, 1).astype(jnp.float32)  # tiny; loop-invariant

    out = pl.pallas_call(
        attention_kernel,
        out_shape=jax.ShapeDtypeStruct((Bp, F), out_dtype),
        grid_spec=pltpu.PrefetchScalarGridSpec(
            num_scalar_prefetch=0,
            grid=(nb,),
            in_specs=[
                pl.BlockSpec((bblk, S, F), lambda i: (i, 0, 0)),   # x batch tile
                pl.BlockSpec((F, 1), lambda i: (0, 0)),            # weight
                pl.BlockSpec((1, S, 1), lambda i: (0, 0, 0)),      # bias
            ],
            out_specs=pl.BlockSpec((bblk, F), lambda i: (i, 0)),
        ),
        compiler_params=pltpu.CompilerParams(
            dimension_semantics=("parallel",),       # independent batch blocks
            vmem_limit_bytes=32 * 1024 * 1024,       # safe on v5e/v6e and <= half of v7x
        ),
    )(x, w2d, b3d)

    return out[:B]


def reference_forward(x, weight, bias):
    B, S, F = x.shape
    eij = (x.reshape(-1, F) @ weight).reshape(B, S) + bias
    eij = jnp.tanh(eij)
    a = jnp.exp(eij)
    a = a / jnp.sum(a, axis=1, keepdims=True) + 1e-10
    return jnp.sum(x * a[..., None], axis=1)


if __name__ == "__main__":
    # Shapes consistent with the module: batch=2, step_dim=8, feature_dim=32
    batch, step_dim, feature_dim = 2, 8, 32

    key = jax.random.PRNGKey(0)
    kx, kw, kx2 = jax.random.split(key, 3)

    x = jax.random.normal(kx, (batch, step_dim, feature_dim), dtype=jnp.float32)

    # nn.init.xavier_uniform_ on (feature_dim, 1): U(-bound, bound),
    # bound = sqrt(6 / (feature_dim + 1))
    bound = (6.0 / (feature_dim + 1)) ** 0.5
    weight = jax.random.uniform(kw, (feature_dim, 1), dtype=jnp.float32,
                                minval=-bound, maxval=bound)
    bias = jnp.zeros((step_dim,), dtype=jnp.float32)

    out = jax.block_until_ready(attention_forward(x, weight, bias))
    ref = reference_forward(x, weight, bias)
    assert out.shape == (batch, feature_dim)
    assert jnp.allclose(out, ref, atol=2e-3, rtol=2e-3), "mismatch vs reference"

    # Second check: exercise the multi-block grid + ragged batch padding path
    # by forcing a tiny batch block (bblk=8 -> 3 blocks for B=20).
    x2 = jax.random.normal(kx2, (20, step_dim, feature_dim), dtype=jnp.float32)
    out2 = jax.block_until_ready(
        attention_forward(x2, weight, bias, block_target_bytes=8 * 1024))
    ref2 = reference_forward(x2, weight, bias)
    assert out2.shape == (20, feature_dim)
    assert jnp.allclose(out2, ref2, atol=2e-3, rtol=2e-3), "mismatch (tiled path)"

    print("KERNEL_OK")
</pallas_src>

<mosaic_0001>
module attributes {stable_mosaic.version = 11 : i64} {
  func.func @attention_kernel(%arg0: i32, %arg1: memref<2x8x32xf32, #tpu.memory_space<vmem>>, %arg2: memref<32x1xf32, #tpu.memory_space<vmem>>, %arg3: memref<1x8x1xf32, #tpu.memory_space<vmem>>, %arg4: memref<2x32xf32, #tpu.memory_space<vmem>>) attributes {dimension_semantics = [#tpu.dimension_semantics<parallel>], iteration_bounds = array<i64: 1>, scalar_prefetch = 0 : i64, scratch_operands = 0 : i64, tpu.core_type = #tpu.core_type<tc>, window_params = [{transform_indices = @transform_0, window_bounds = array<i64: 2, 8, 32>}, {pipeline_mode = #tpu.pipeline_mode<synchronous>, transform_indices = @transform_1, window_bounds = array<i64: 32, 1>}, {pipeline_mode = #tpu.pipeline_mode<synchronous>, transform_indices = @transform_2, window_bounds = array<i64: 1, 8, 1>}, {transform_indices = @transform_3, window_bounds = array<i64: 2, 32>}]} {
    %c0 = arith.constant 0 : index
    %c0_0 = arith.constant 0 : index
    %c0_1 = arith.constant 0 : index
    %0 = vector.load %arg1[%c0, %c0_0, %c0_1] : memref<2x8x32xf32, #tpu.memory_space<vmem>>, vector<2x8x32xf32>
    %1 = vector.shape_cast %0 : vector<2x8x32xf32> to vector<16x32xf32>
    %c0_2 = arith.constant 0 : index
    %c0_3 = arith.constant 0 : index
    %2 = vector.load %arg2[%c0_2, %c0_3] : memref<32x1xf32, #tpu.memory_space<vmem>>, vector<32x1xf32>
    %cst = arith.constant dense<0.000000e+00> : vector<16x1xf32>
    %3 = tpu.matmul %1, %2, %cst {dimension_numbers = #tpu.dot_dimension_numbers<[1], [0], [0], [1], [0, 0, 1, 1], [], []>} : vector<16x32xf32>, vector<32x1xf32>, vector<16x1xf32> -> vector<16x1xf32>
    %4 = vector.shape_cast %3 : vector<16x1xf32> to vector<2x8x1xf32>
    %c0_4 = arith.constant 0 : index
    %c0_5 = arith.constant 0 : index
    %c0_6 = arith.constant 0 : index
    %5 = vector.load %arg3[%c0_4, %c0_5, %c0_6] : memref<1x8x1xf32, #tpu.memory_space<vmem>>, vector<1x8x1xf32>
    %6 = vector.broadcast %5 : vector<1x8x1xf32> to vector<2x8x1xf32>
    %7 = arith.addf %4, %6 : vector<2x8x1xf32>
    %8 = math.tanh %7 : vector<2x8x1xf32>
    %9 = math.exp %8 : vector<2x8x1xf32>
    %cst_7 = arith.constant dense<0.000000e+00> : vector<2x1xf32>
    %10 = vector.multi_reduction <add>, %9, %cst_7 [1] : vector<2x8x1xf32> to vector<2x1xf32>
    %11 = vector.shape_cast %10 : vector<2x1xf32> to vector<2x1x1xf32>
    %12 = tpu.reciprocal %11 {approx = true} : vector<2x1x1xf32> -> vector<2x1x1xf32>
    %13 = vector.broadcast %12 : vector<2x1x1xf32> to vector<2x8x1xf32>
    %14 = arith.mulf %9, %13 : vector<2x8x1xf32>
    %cst_8 = arith.constant 1.000000e-10 : f32
    %15 = vector.broadcast %cst_8 : f32 to vector<2x8x1xf32>
    %16 = arith.addf %14, %15 : vector<2x8x1xf32>
    %17 = vector.broadcast %16 : vector<2x8x1xf32> to vector<2x8x32xf32>
    %18 = arith.mulf %0, %17 : vector<2x8x32xf32>
    %cst_9 = arith.constant dense<0.000000e+00> : vector<2x32xf32>
    %19 = vector.multi_reduction <add>, %18, %cst_9 [1] : vector<2x8x32xf32> to vector<2x32xf32>
    %c0_10 = arith.constant 0 : index
    %c0_11 = arith.constant 0 : index
    %20 = vector.load %arg4[%c0_10, %c0_11] : memref<2x32xf32, #tpu.memory_space<vmem>>, vector<2x32xf32>
    tpu.vector_store %arg4[%c0_10, %c0_11], %19 {strides = array<i32>} : memref<2x32xf32, #tpu.memory_space<vmem>>, vector<2x32xf32>,
    return
  }
  func.func @transform_0(%arg0: i32) -> (i32, i32, i32) {
    %c0_i32 = arith.constant 0 : i32
    %c0_i32_0 = arith.constant 0 : i32
    %c0_i32_1 = arith.constant 0 : i32
    return %arg0, %c0_i32, %c0_i32_0 : i32, i32, i32
  }
  func.func @transform_1(%arg0: i32) -> (i32, i32) {
    %c0_i32 = arith.constant 0 : i32
    %c0_i32_0 = arith.constant 0 : i32
    %c0_i32_1 = arith.constant 0 : i32
    return %c0_i32, %c0_i32_0 : i32, i32
  }
  func.func @transform_2(%arg0: i32) -> (i32, i32, i32) {
    %c0_i32 = arith.constant 0 : i32
    %c0_i32_0 = arith.constant 0 : i32
    %c0_i32_1 = arith.constant 0 : i32
    %c0_i32_2 = arith.constant 0 : i32
    return %c0_i32, %c0_i32_0, %c0_i32_1 : i32, i32, i32
  }
  func.func @transform_3(%arg0: i32) -> (i32, i32) {
    %c0_i32 = arith.constant 0 : i32
    %c0_i32_0 = arith.constant 0 : i32
    return %arg0, %c0_i32 : i32, i32
  }
}

</mosaic_0001>

<bundles_post_ra>
// kernel: tpu_custom_call.1
= control target key start
LH: loop header
LB: loop body
LE: loop exit
PB: predicated region body
PF: predicated region fallthrough
CT: control target
= control target key end

     0   :  { %vm21_vm0 = vcmask 261120   ;;  %s305_s0 = inlined_call_operand.vmem [shape: f32[2,8,32], index: 0, kind: input, shape index: {}]   ;;  %s306_s1 = inlined_call_operand.vmem [shape: f32[32,1], index: 1, kind: input, shape index: {}]   ;;  %s307_s2 = inlined_call_operand.vmem [shape: f32[1,8,1], index: 2, kind: input, shape index: {}]   ;;  %s308_s3 = inlined_call_operand.hbm [shape: f32[2,32], index: 3, kind: output, shape index: {}]  }
   0x1   :  { %v17_v0 = vld [vmem:[%s306_s1] sm:$0xff]  ;;  %v18_v1 = vld [vmem:[%s306_s1 + $0x8] sm:$0xff]  ;;  %v19_v2 = vld [vmem:[%s306_s1 + $0x10] sm:$0xff] }
   0x2   :  { %v199_v3 = vpack.c.bf16 %v18_v1, %v17_v0  ;;  %v20_v4 = vld [vmem:[%s306_s1 + $0x18] sm:$0xff]  ;;  %v15_v5 = vld [vmem:[%s305_s0] sm:$0xff] }
   0x3   :  { %v203_v6 = vpack.c.bf16 %v20_v4, %v19_v2  ;;  %196 = vmatprep.mubr.msk.f32.mxu0 %vm21_vm0, %v15_v5 }
   0x4   :  { %8 = vsyncpa [#allocation3], 0  ;;  %200 = vmatprep.subr.bf16.mxu0 %v199_v3  ;;  %v16_v7 = vld [vmem:[%s305_s0 + $0x8] sm:$0xff]  ;;  %v246_v8 = vmov 0   ;;  %v103_v9 = vld [vmem:[%s307_s2] sm:$0xff]  ;;  %vm112_vm1 = vcmask 7168  }
   0x5   :  { %202 = vmatpush3.bf16.msra.mxu0 %v199_v3  ;;  %209 = vset.pattern.permute.xlu0 %v246_v8  ;;  %s247_s0 = smov [#allocation2]   ;;  %vm161_vm2 = vcmask 1041409   ;;  %vm164_vm3 = vcmask 254976  }
   0x6   :  { %204 = vmatprep.subr.bf16.mxu0 %v203_v6  ;;  %s172_s2 = sshll.u32 %s247_s0, 4  ;;  %s173_s2 = int_to_ptr.vmem [resolvable:$true] %s172_s2 }
   0x7   :  { %s222_s25 = scalar_lea.vmem %s173_s2, 32  ;;  %p227_p1 = scmp.lt.s32.totalorder %s173_s2, %s173_s2 }
   0x8   :  { %p223_p0 = scmp.ne.s32.totalorder %s173_s2, %s222_s25  ;;  %p228_p2 = scmp.lt.s32.totalorder %s222_s25, %s222_s25 }
   0x9   :  { %206 = vmatpush3.bf16.msra.mxu0 %v203_v6 }
   0xa   :  { %p229_p3 = por %p228_p2, %p227_p1 }
   0xc   :  { %197 = vmatmul.mubr.msk.f32.vlgmr.msra.gmra.mrb[0].mxu0 %vm21_vm0, %v16_v7  ;;  %p230_p4 = pnand %p229_p3, %p223_p0 }
  0xdf   :  { %v198_v10 = vpop.f32.mrb[0].mxu0 }
  0xe0   :  { %v105_v11 = vadd.f32 %v198_v10, %v103_v9  ;;  %v94_v12 = vpop.f32.mrb[1].mxu0 }
  0xe1   :  { %v104_v13 = vadd.f32 %v103_v9, %v94_v12 }
  0xe2   :  { %210 = vtanh.f32 %v105_v11 }
  0xe3   :  { %212 = vtanh.f32 %v104_v13 }
  0xec   :  { %v211_v14 = vpop.eup %210 }
  0xed   :  { %v213_v15 = vpop.eup %212  ;;  %v110_v16 = vmul.f32 1.442695, %v211_v14 }
  0xee   :  { %v108_v17 = vmul.f32 1.442695, %v213_v15 }
  0xef   :  { %214 = vpow2.f32 %v110_v16 }
  0xf0   :  { %216 = vpow2.f32 %v108_v17 }
  0xf9   :  { %v215_v18 = vpop.eup %214 }
  0xfa   :  { %v217_v19 = vpop.eup %216  ;;  %v120_v20 = vsel %vm112_vm1, %v215_v18, 0.0 }
  0xfb   :  { %v121_v21 = vrot.slane %v120_v20, 4  ;;  %v113_v22 = vsel %vm112_vm1, %v217_v19, 0.0 }
  0xfc   :  { %v114_v23 = vrot.slane %v113_v22, 4 }
  0xfd   :  { %v122_v24 = vadd.f32 %v121_v21, %v120_v20 }
  0xfe   :  { %v115_v25 = vadd.f32 %v114_v23, %v113_v22 }
  0xff   :  { %v123_v26 = vrot.slane %v122_v24, 2 }
 0x100   :  { %v116_v27 = vrot.slane %v115_v25, 2 }
 0x101   :  { %v124_v28 = vadd.f32 %v123_v26, %v122_v24 }
 0x102   :  { %v117_v29 = vadd.f32 %v116_v27, %v115_v25 }
 0x103   :  { %v125_v30 = vrot.slane %v124_v28, 1 }
 0x104   :  { %v118_v31 = vrot.slane %v117_v29, 1 }
 0x105   :  { %v126_v32 = vadd.f32 %v125_v30, %v124_v28 }
 0x106   :  { %v119_v33 = vadd.f32 %v118_v31, %v117_v29 }
 0x107   :  { %218 = vrcp.f32 %v126_v32 }
 0x108   :  { %220 = vrcp.f32 %v119_v33 }
 0x111   :  { %v219_v34 = vpop.eup %218 }
 0x112   :  { %v221_v35 = vpop.eup %220  ;;  %v130_v38 = vmul.f32 %v219_v34, %v215_v18 }
 0x113   :  { %v129_v36 = vmul.f32 %v221_v35, %v217_v19 }
 0x114   :  { %v132_v39 = vadd.f32 1e-10, %v130_v38 }
 0x115   :  { %v131_v37 = vadd.f32 1e-10, %v129_v36 }
 0x117   :  { %135 = vperm.xlu0 %209, %v131_v37  }
 0x11b   :  { %140 = vperm.xlu0 %209, %v132_v39  }
 0x196   :  { %v136_v40 = vpop.permute.xlu0 %135 }
 0x197   :  { %v143_v41 = vmul.f32 %v136_v40, %v15_v5 }
 0x199   :  { %v145_v42 = vsel %vm21_vm0, %v143_v41, 0.0 }
 0x19a   :  { %v146_v43 = vrot.slane %v145_v42, 4  ;;  %v141_v44 = vpop.permute.xlu0 %140 }
 0x19b   :  { %v144_v45 = vmul.f32 %v141_v44, %v16_v7 }
 0x19c   :  { %v147_v46 = vadd.f32 %v146_v43, %v145_v42 }
 0x19d   :  { %v152_v47 = vsel %vm21_vm0, %v144_v45, 0.0 }
 0x19e   :  { %v148_v48 = vrot.slane %v147_v46, 2  ;;  %v153_v49 = vrot.slane %v152_v47, 4 }
 0x1a0   :  { %v149_v50 = vadd.f32 %v148_v48, %v147_v46  ;;  %v154_v51 = vadd.f32 %v153_v49, %v152_v47 }
 0x1a2   :  { %v155_v52 = vrot.slane %v154_v51, 2  ;;  %v150_v53 = vrot.slane %v149_v50, 1 }
 0x1a4   :  { %v156_v54 = vadd.f32 %v155_v52, %v154_v51  ;;  %v151_v56 = vadd.f32 %v150_v53, %v149_v50 }
 0x1a6   :  { %v157_v55 = vrot.slane %v156_v54, 1 }
 0x1a8   :  { %v158_v57 = vadd.f32 %v157_v55, %v156_v54 }
 0x1aa   :  { %v162_v58 = vsel %vm161_vm2, %v158_v57, %v151_v56 }
 0x1ab   :  { %165 = vst.msk [vmem:[#allocation2] sm:$0x3] %vm164_vm3, %v162_v58 }
 0x1ac   :  { %233 = shalt.err (!%p230_p4)
}
 0x1ad   :  { %s234_s28 = scalar_lea.hbm %s308_s3, 32 }
 0x1ae   :  { %p235_p5 = scmp.ne.s32.totalorder %s308_s3, %s234_s28  ;;  %p238_p6 = scmp.lt.u32.totalorder %s234_s28, %s308_s3 }
 0x1b0   :  { %p240_p7 = pnand %p238_p6, %p235_p5 }
 0x1b2   :  { %243 = shalt.err (!%p240_p7)
}
 0x1b3   :  { %175 = dma.vmem_to_hbm [thread:$0]  %s173_s2, 32, %s308_s3, [#allocation3]  }
 0x1b4   :  { %244 = dma.done.wait [#allocation3], 32  }
 0x1b5   :  { %245 = vsyncadd [#allocation3], 4294967264 }
 0x1b6   :  { %179 = vsyncpa [#allocation3], 1 }

</bundles_post_ra>
